<compile_context>
chip_gen: v7x
topology: tpu7x:2x2x1
jax: 0.10.0
libtpu: 0.0.40
codegen_flags: <defaults>
</compile_context>

<pallas_src>
import functools

import jax
import jax.numpy as jnp
from jax.experimental import pallas as pl
from jax.experimental.pallas import tpu as pltpu


# ----------------------------------------------------------------------------
# Sizing helpers
# ----------------------------------------------------------------------------
def _round_up(x, m):
    return ((x + m - 1) // m) * m


def _pick_vmem_limit():
    """Generation-aware scoped-VMEM ceiling (bytes) for CompilerParams."""
    cap = 64 * 1024 * 1024  # conservative fallback: v7x per-TensorCore physical VMEM
    try:
        info = pltpu.get_tpu_info()
        for attr in ("vmem_capacity_bytes", "vmem_size_bytes"):
            c = getattr(info, attr, None)
            if c:
                cap = int(c)
                break
    except Exception:
        pass
    # Leave headroom below physical; never request more than 96 MiB scoped.
    return max(32 * 1024 * 1024, min((cap * 3) // 4, 96 * 1024 * 1024))


def _choose_tile_n(C, n_pad, vmem_limit, min_steps=8, hard_cap=1024):
    """Lane tile tn: multiple of 128, divides n_pad, prefers >= min_steps grid
    steps so prologue/epilogue DMAs stay hidden.  One f32 (C, tn) buffer is
    budgeted at ~vmem_limit/10 because the in-kernel working set is several
    such buffers (double-buffered in/out + qn/ms temporaries)."""
    by_vmem = ((vmem_limit // 10) // (4 * C)) // 128 * 128
    cap = max(128, min(hard_cap, by_vmem, n_pad))
    divs = [d for d in range(128, cap + 1, 128) if n_pad % d == 0]
    if not divs:
        return 128
    good = [d for d in divs if n_pad // d >= min_steps]
    return max(good) if good else max(divs)


# ----------------------------------------------------------------------------
# Fused single-HBM-read kernel: grid (B, phase, n_tiles)
# ----------------------------------------------------------------------------
def _ca_fused_kernel(gamma_ref, x_ref, o_ref, x_stage, mat_acc, den_acc,
                     *, eps, n_real):
    ph = pl.program_id(1)
    nt = pl.program_id(2)

    @pl.when(ph == 0)
    def _stats():
        @pl.when(nt == 0)
        def _init():
            mat_acc[...] = jnp.zeros_like(mat_acc)
            den_acc[...] = jnp.zeros_like(den_acc)

        xin = x_ref[...]                                    # (C, tn), input dtype
        x_stage[nt] = xin                                   # stage for phase 1 (VMEM)

        x = xin.astype(jnp.float32)
        col_sq = jnp.sum(x * x, axis=0, keepdims=True)      # (1, tn)
        vsum = jnp.sum(x, axis=0, keepdims=True)            # (1, tn)
        # Guarded rsqrt: zero / padded columns contribute nothing (no Inf/NaN).
        inv_norm = jnp.where(col_sq > 0, jax.lax.rsqrt(col_sq), 0.0)
        qn = x * inv_norm                                   # normalized Q == K
        s = vsum * inv_norm + eps                           # == sum_c qn + eps

        # Gram += x @ qn^T : contract the lane (N) axes directly on the MXU.
        mat_acc[...] += jax.lax.dot_general(
            x, qn, (((1,), (1,)), ((), ())),
            preferred_element_type=jnp.float32)             # (C, C)
        den_acc[...] += jnp.sum(qn * s, axis=1, keepdims=True)   # (C, 1)

    @pl.when(ph == 1)
    def _apply():
        xt = x_stage[nt].astype(jnp.float32)                # from VMEM, not HBM
        col_sq = jnp.sum(xt * xt, axis=0, keepdims=True)
        vsum = jnp.sum(xt, axis=0, keepdims=True)
        inv_norm = jnp.where(col_sq > 0, jax.lax.rsqrt(col_sq), 0.0)
        qn = xt * inv_norm

        # gamma folded into the tailor weight: wt = gamma / (N + den).
        wt = gamma_ref[0] / (n_real + den_acc[...])          # (C, 1)
        ms = vsum + jnp.dot(mat_acc[...], qn,
                            preferred_element_type=jnp.float32)   # (C, tn)
        o_ref[...] = (xt + wt * ms).astype(o_ref.dtype)


# ----------------------------------------------------------------------------
# Two-pass fallback (slab too large to stage in VMEM)
# ----------------------------------------------------------------------------
def _ca_stats_kernel(x_ref, mat_ref, den_ref, *, eps):
    """Pass 1: accumulate Gram / denominator directly into the resident output
    blocks (no scratch)."""
    nt = pl.program_id(2)

    @pl.when(nt == 0)
    def _init():
        mat_ref[...] = jnp.zeros_like(mat_ref)
        den_ref[...] = jnp.zeros_like(den_ref)

    x = x_ref[...].astype(jnp.float32)                      # (C, tn)
    col_sq = jnp.sum(x * x, axis=0, keepdims=True)
    vsum = jnp.sum(x, axis=0, keepdims=True)
    inv_norm = jnp.where(col_sq > 0, jax.lax.rsqrt(col_sq), 0.0)
    qn = x * inv_norm
    s = vsum * inv_norm + eps

    mat_ref[...] += jax.lax.dot_general(
        x, qn, (((1,), (1,)), ((), ())), preferred_element_type=jnp.float32)
    den_ref[...] += jnp.sum(qn * s, axis=1, keepdims=True)


def _ca_apply_kernel(x_ref, mat_ref, wt_ref, o_ref):
    """Pass 2: out = x + wt * (vsum + mat @ qn), wt = gamma/(N + den) precomputed."""
    x = x_ref[...].astype(jnp.float32)
    col_sq = jnp.sum(x * x, axis=0, keepdims=True)
    vsum = jnp.sum(x, axis=0, keepdims=True)
    inv_norm = jnp.where(col_sq > 0, jax.lax.rsqrt(col_sq), 0.0)
    qn = x * inv_norm
    ms = vsum + jnp.dot(mat_ref[...], qn, preferred_element_type=jnp.float32)
    o_ref[...] = (x + wt_ref[...] * ms).astype(o_ref.dtype)


# ----------------------------------------------------------------------------
# Wrapper
# ----------------------------------------------------------------------------
def shared_channel_attention(x, gamma, eps=1e-6, force_two_pass=False):
    """x: (B, C, W, H), gamma: (1,).  Mirrors SharedChannelAttention.forward."""
    B, C, W, H = x.shape
    assert W == H, "reference module's residual add requires square spatial dims"
    N = W * H
    x_flat = x.reshape(B, C, N)
    gamma = jnp.asarray(gamma, jnp.float32).reshape(1)

    vmem_limit = _pick_vmem_limit()

    # Pad N up to a multiple of 128 (padded columns are inert: guarded rsqrt).
    n_pad = max(128, _round_up(N, 128))
    if n_pad != N:
        x_flat = jnp.pad(x_flat, ((0, 0), (0, 0), (0, n_pad - N)))

    tn = _choose_tile_n(C, n_pad, vmem_limit)
    n_tiles = n_pad // tn

    itemsize = jnp.dtype(x.dtype).itemsize
    fused_bytes = (C * n_pad * itemsize          # staged per-batch slab
                   + 4 * C * tn * itemsize       # double-buffered in/out tiles
                   + 6 * C * tn * 4              # f32 temporaries (x, qn, ms, ...)
                   + 2 * C * C * 4 + C * 4
                   + (1 << 20))                  # margin
    use_fused = (not force_two_pass) and fused_bytes <= int(0.9 * vmem_limit)

    if use_fused:
        out_flat = pl.pallas_call(
            functools.partial(_ca_fused_kernel, eps=eps, n_real=float(N)),
            out_shape=jax.ShapeDtypeStruct((B, C, n_pad), x.dtype),
            grid_spec=pltpu.PrefetchScalarGridSpec(
                num_scalar_prefetch=0,
                grid=(B, 2, n_tiles),
                in_specs=[
                    pl.BlockSpec(memory_space=pltpu.MemorySpace.SMEM),   # gamma (1,)
                    pl.BlockSpec(
                        (None, C, tn),
                        # Phase 0 streams tile n; phase 1 pins the index to the
                        # last tile so x is never re-read from HBM.
                        lambda b, ph, n: (b, 0, n * (1 - ph) + (n_tiles - 1) * ph)),
                ],
                out_specs=pl.BlockSpec(
                    (None, C, tn),
                    # Phase 0 never writes (index pinned at tile 0, no block
                    # change -> no write-back); phase 1 writes tile n.
                    lambda b, ph, n: (b, 0, n * ph)),
                scratch_shapes=[
                    pltpu.VMEM((n_tiles, C, tn), x.dtype),   # staged slab
                    pltpu.VMEM((C, C), jnp.float32),         # Gram accumulator
                    pltpu.VMEM((C, 1), jnp.float32),         # denominator accumulator
                ]),
            compiler_params=pltpu.CompilerParams(
                dimension_semantics=("parallel", "arbitrary", "arbitrary"),
                vmem_limit_bytes=vmem_limit),
        )(gamma, x_flat)
    else:
        # --- Pass 1: split the reduction over a second parallel axis so both
        # v7x TensorCores are busy even at B == 1 (no effect on v5e/v6e).
        nsplit = 2 if (n_tiles % 2 == 0 and n_tiles >= 2) else 1
        tiles_ps = n_tiles // nsplit

        mat_parts, den_parts = pl.pallas_call(
            functools.partial(_ca_stats_kernel, eps=eps),
            out_shape=(jax.ShapeDtypeStruct((B, nsplit, C, C), jnp.float32),
                       jax.ShapeDtypeStruct((B, nsplit, C, 1), jnp.float32)),
            grid_spec=pltpu.PrefetchScalarGridSpec(
                num_scalar_prefetch=0,
                grid=(B, nsplit, tiles_ps),
                in_specs=[pl.BlockSpec(
                    (None, C, tn), lambda b, p, n: (b, 0, p * tiles_ps + n))],
                out_specs=[
                    pl.BlockSpec((None, None, C, C), lambda b, p, n: (b, p, 0, 0)),
                    pl.BlockSpec((None, None, C, 1), lambda b, p, n: (b, p, 0, 0)),
                ]),
            compiler_params=pltpu.CompilerParams(
                dimension_semantics=("parallel", "parallel", "arbitrary"),
                vmem_limit_bytes=vmem_limit),
        )(x_flat)

        # Tiny host-side combine + gamma fold (negligible work).
        mat = mat_parts.sum(axis=1)                      # (B, C, C)
        den = den_parts.sum(axis=1)                      # (B, C, 1)
        wt = gamma[0] / (float(N) + den)                 # gamma folded into tailor

        # --- Pass 2: fully parallel apply.
        out_flat = pl.pallas_call(
            _ca_apply_kernel,
            out_shape=jax.ShapeDtypeStruct((B, C, n_pad), x.dtype),
            grid_spec=pltpu.PrefetchScalarGridSpec(
                num_scalar_prefetch=0,
                grid=(B, n_tiles),
                in_specs=[
                    pl.BlockSpec((None, C, tn), lambda b, n: (b, 0, n)),
                    pl.BlockSpec((None, C, C), lambda b, n: (b, 0, 0)),
                    pl.BlockSpec((None, C, 1), lambda b, n: (b, 0, 0)),
                ],
                out_specs=pl.BlockSpec((None, C, tn), lambda b, n: (b, 0, n))),
            compiler_params=pltpu.CompilerParams(
                dimension_semantics=("parallel", "parallel"),
                vmem_limit_bytes=vmem_limit),
        )(x_flat, mat, wt)

    if n_pad != N:
        out_flat = out_flat[:, :, :N]
    # torch does .view(B, C, height, width); with W == H this equals (B, C, W, H).
    return out_flat.reshape(B, C, H, W)


# ----------------------------------------------------------------------------
# Pure-JAX reference (transcription of the PyTorch forward) for verification.
# ----------------------------------------------------------------------------
def _reference_forward(x, gamma, eps=1e-6):
    B, C, W, H = x.shape
    N = W * H
    xf = x.reshape(B, C, N)
    inv = 1.0 / jnp.sqrt(jnp.sum(xf * xf, axis=1, keepdims=True))
    Q = xf * inv
    s = jnp.sum(Q, axis=1) + eps                              # (B, N)
    denom = N + jnp.einsum('bcn,bn->bc', Q, s)                # (B, C)
    tailor = 1.0 / denom
    vsum = jnp.sum(xf, axis=1)                                # (B, N)
    matrix = jnp.einsum('bcn,bmn->bcm', xf, Q)                # (B, C, C)
    ms = vsum[:, None, :] + jnp.einsum('bcm,bmn->bcn', matrix, Q)
    wv = ms * tailor[:, :, None]
    return (xf + gamma[0] * wv).reshape(B, C, H, W)


if __name__ == "__main__":
    # Module __init__ sets gamma = zeros(1); use a nonzero value so the
    # attention path is actually exercised (not just the residual).
    gamma = jnp.array([0.5], dtype=jnp.float32)

    # --- Test A: small canonical shape, fused single-read path.
    key = jax.random.PRNGKey(0)
    B, C, W, H = 2, 4, 16, 16
    xA = jax.random.normal(key, (B, C, W, H), dtype=jnp.float32)
    outA = jax.block_until_ready(shared_channel_attention(xA, gamma))
    refA = _reference_forward(xA, gamma)
    assert outA.shape == (B, C, H, W)
    assert jnp.allclose(outA, refA, atol=1e-4, rtol=1e-4), "fused path mismatch"

    # --- Test B: multi-tile shape; fused path and forced two-pass fallback
    # (exercises cross-tile accumulation and the NSPLIT=2 parallel reduction).
    xB = jax.random.normal(jax.random.PRNGKey(1), (1, 8, 32, 32), dtype=jnp.float32)
    refB = _reference_forward(xB, gamma)
    outB1 = jax.block_until_ready(shared_channel_attention(xB, gamma))
    assert jnp.allclose(outB1, refB, atol=1e-4, rtol=1e-4), "fused multi-tile mismatch"
    outB2 = jax.block_until_ready(
        shared_channel_attention(xB, gamma, force_two_pass=True))
    assert jnp.allclose(outB2, refB, atol=1e-4, rtol=1e-4), "two-pass path mismatch"

    # --- Test C: ragged spatial size (N not a multiple of 128) -> padded path.
    xC = jax.random.normal(jax.random.PRNGKey(2), (1, 8, 12, 12), dtype=jnp.float32)
    outC = jax.block_until_ready(shared_channel_attention(xC, gamma))
    assert jnp.allclose(outC, _reference_forward(xC, gamma),
                        atol=1e-4, rtol=1e-4), "padded path mismatch"

    print("KERNEL_OK")
</pallas_src>

<mosaic_0001>
module attributes {stable_mosaic.version = 11 : i64} {
  func.func @_ca_fused_kernel(%arg0: i32, %arg1: i32, %arg2: i32, %arg3: memref<1xf32, #tpu.memory_space<smem>>, %arg4: memref<1x4x256xf32, #tpu.memory_space<vmem>>, %arg5: memref<1x4x256xf32, #tpu.memory_space<vmem>>, %arg6: memref<1x4x256xf32, #tpu.memory_space<vmem>>, %arg7: memref<4x4xf32, #tpu.memory_space<vmem>>, %arg8: memref<4x1xf32, #tpu.memory_space<vmem>>) attributes {dimension_semantics = [#tpu.dimension_semantics<parallel>, #tpu.dimension_semantics<arbitrary>, #tpu.dimension_semantics<arbitrary>], iteration_bounds = array<i64: 2, 2, 1>, scalar_prefetch = 0 : i64, scratch_operands = 3 : i64, tpu.core_type = #tpu.core_type<tc>, window_params = [{transform_indices = @transform_0, window_bounds = array<i64: 1>}, {transform_indices = @transform_1, window_bounds = array<i64: 1, 4, 256>}, {transform_indices = @transform_2, window_bounds = array<i64: 1, 4, 256>}]} {
    %c0_i32 = arith.constant 0 : i32
    %0 = arith.cmpi eq, %arg1, %c0_i32 : i32
    %1 = arith.extui %0 : i1 to i32
    %c0_i32_0 = arith.constant 0 : i32
    %2 = arith.cmpi ne, %1, %c0_i32_0 : i32
    scf.if %2 {
      %c0_i32_2 = arith.constant 0 : i32
      %6 = arith.cmpi eq, %arg2, %c0_i32_2 : i32
      %7 = arith.extui %6 : i1 to i32
      %c0_i32_3 = arith.constant 0 : i32
      %8 = arith.cmpi ne, %7, %c0_i32_3 : i32
      scf.if %8 {
        %cst_22 = arith.constant 0.000000e+00 : f32
        %41 = vector.broadcast %cst_22 : f32 to vector<4x4xf32>
        %c0_23 = arith.constant 0 : index
        %c0_24 = arith.constant 0 : index
        %42 = vector.load %arg7[%c0_23, %c0_24] : memref<4x4xf32, #tpu.memory_space<vmem>>, vector<4x4xf32>
        tpu.vector_store %arg7[%c0_23, %c0_24], %41 {strides = array<i32>} : memref<4x4xf32, #tpu.memory_space<vmem>>, vector<4x4xf32>,
        %cst_25 = arith.constant 0.000000e+00 : f32
        %43 = vector.broadcast %cst_25 : f32 to vector<4x1xf32>
        %c0_26 = arith.constant 0 : index
        %c0_27 = arith.constant 0 : index
        %44 = vector.load %arg8[%c0_26, %c0_27] : memref<4x1xf32, #tpu.memory_space<vmem>>, vector<4x1xf32>
        tpu.vector_store %arg8[%c0_26, %c0_27], %43 {strides = array<i32>} : memref<4x1xf32, #tpu.memory_space<vmem>>, vector<4x1xf32>,
      } else {
      }
      %c0 = arith.constant 0 : index
      %c0_4 = arith.constant 0 : index
      %c0_5 = arith.constant 0 : index
      %9 = vector.load %arg4[%c0, %c0_4, %c0_5] : memref<1x4x256xf32, #tpu.memory_space<vmem>>, vector<1x4x256xf32>
      %10 = vector.shape_cast %9 : vector<1x4x256xf32> to vector<4x256xf32>
      %11 = arith.index_cast %arg2 : i32 to index
      %c0_6 = arith.constant 0 : index
      %c0_7 = arith.constant 0 : index
      %12 = vector.load %arg6[%11, %c0_6, %c0_7] : memref<1x4x256xf32, #tpu.memory_space<vmem>>, vector<1x4x256xf32>
      %13 = vector.shape_cast %12 : vector<1x4x256xf32> to vector<4x256xf32>
      %14 = vector.shape_cast %10 : vector<4x256xf32> to vector<1x4x256xf32>
      tpu.vector_store %arg6[%11, %c0_6, %c0_7], %14 {strides = array<i32>} : memref<1x4x256xf32, #tpu.memory_space<vmem>>, vector<1x4x256xf32>,
      %15 = arith.mulf %10, %10 : vector<4x256xf32>
      %cst = arith.constant dense<0.000000e+00> : vector<256xf32>
      %16 = vector.multi_reduction <add>, %15, %cst [0] : vector<4x256xf32> to vector<256xf32>
      %17 = vector.shape_cast %16 : vector<256xf32> to vector<1x256xf32>
      %cst_8 = arith.constant dense<0.000000e+00> : vector<256xf32>
      %18 = vector.multi_reduction <add>, %10, %cst_8 [0] : vector<4x256xf32> to vector<256xf32>
      %19 = vector.shape_cast %18 : vector<256xf32> to vector<1x256xf32>
      %cst_9 = arith.constant 0.000000e+00 : f32
      %20 = vector.broadcast %cst_9 : f32 to vector<1x256xf32>
      %21 = arith.cmpf ogt, %17, %20 : vector<1x256xf32>
      %22 = math.rsqrt %17 : vector<1x256xf32>
      %cst_10 = arith.constant 0.000000e+00 : f32
      %23 = vector.broadcast %cst_10 : f32 to vector<1x256xf32>
      %24 = arith.select %21, %22, %23 : vector<1x256xi1>, vector<1x256xf32>
      %25 = vector.broadcast %24 : vector<1x256xf32> to vector<4x256xf32>
      %26 = arith.mulf %10, %25 : vector<4x256xf32>
      %27 = arith.mulf %19, %24 : vector<1x256xf32>
      %cst_11 = arith.constant 9.99999997E-7 : f32
      %28 = vector.broadcast %cst_11 : f32 to vector<1x256xf32>
      %29 = arith.addf %27, %28 : vector<1x256xf32>
      %c0_12 = arith.constant 0 : index
      %c0_13 = arith.constant 0 : index
      %30 = vector.load %arg7[%c0_12, %c0_13] : memref<4x4xf32, #tpu.memory_space<vmem>>, vector<4x4xf32>
      %cst_14 = arith.constant dense<0.000000e+00> : vector<4x4xf32>
      %31 = tpu.matmul %10, %26, %cst_14 {dimension_numbers = #tpu.dot_dimension_numbers<[1], [1], [0], [0], [0, 0, 1, 0], [], []>} : vector<4x256xf32>, vector<4x256xf32>, vector<4x4xf32> -> vector<4x4xf32>
      %32 = arith.addf %30, %31 : vector<4x4xf32>
      %c0_15 = arith.constant 0 : index
      %c0_16 = arith.constant 0 : index
      %33 = vector.load %arg7[%c0_15, %c0_16] : memref<4x4xf32, #tpu.memory_space<vmem>>, vector<4x4xf32>
      tpu.vector_store %arg7[%c0_15, %c0_16], %32 {strides = array<i32>} : memref<4x4xf32, #tpu.memory_space<vmem>>, vector<4x4xf32>,
      %c0_17 = arith.constant 0 : index
      %c0_18 = arith.constant 0 : index
      %34 = vector.load %arg8[%c0_17, %c0_18] : memref<4x1xf32, #tpu.memory_space<vmem>>, vector<4x1xf32>
      %35 = vector.broadcast %29 : vector<1x256xf32> to vector<4x256xf32>
      %36 = arith.mulf %26, %35 : vector<4x256xf32>
      %cst_19 = arith.constant dense<0.000000e+00> : vector<4xf32>
      %37 = vector.multi_reduction <add>, %36, %cst_19 [1] : vector<4x256xf32> to vector<4xf32>
      %38 = vector.shape_cast %37 : vector<4xf32> to vector<4x1xf32>
      %39 = arith.addf %34, %38 : vector<4x1xf32>
      %c0_20 = arith.constant 0 : index
      %c0_21 = arith.constant 0 : index
      %40 = vector.load %arg8[%c0_20, %c0_21] : memref<4x1xf32, #tpu.memory_space<vmem>>, vector<4x1xf32>
      tpu.vector_store %arg8[%c0_20, %c0_21], %39 {strides = array<i32>} : memref<4x1xf32, #tpu.memory_space<vmem>>, vector<4x1xf32>,
    } else {
    }
    %c1_i32 = arith.constant 1 : i32
    %3 = arith.cmpi eq, %arg1, %c1_i32 : i32
    %4 = arith.extui %3 : i1 to i32
    %c0_i32_1 = arith.constant 0 : i32
    %5 = arith.cmpi ne, %4, %c0_i32_1 : i32
    scf.if %5 {
      %6 = arith.index_cast %arg2 : i32 to index
      %c0 = arith.constant 0 : index
      %c0_2 = arith.constant 0 : index
      %7 = vector.load %arg6[%6, %c0, %c0_2] : memref<1x4x256xf32, #tpu.memory_space<vmem>>, vector<1x4x256xf32>
      %8 = vector.shape_cast %7 : vector<1x4x256xf32> to vector<4x256xf32>
      %9 = arith.mulf %8, %8 : vector<4x256xf32>
      %cst = arith.constant dense<0.000000e+00> : vector<256xf32>
      %10 = vector.multi_reduction <add>, %9, %cst [0] : vector<4x256xf32> to vector<256xf32>
      %11 = vector.shape_cast %10 : vector<256xf32> to vector<1x256xf32>
      %cst_3 = arith.constant dense<0.000000e+00> : vector<256xf32>
      %12 = vector.multi_reduction <add>, %8, %cst_3 [0] : vector<4x256xf32> to vector<256xf32>
      %13 = vector.shape_cast %12 : vector<256xf32> to vector<1x256xf32>
      %cst_4 = arith.constant 0.000000e+00 : f32
      %14 = vector.broadcast %cst_4 : f32 to vector<1x256xf32>
      %15 = arith.cmpf ogt, %11, %14 : vector<1x256xf32>
      %16 = math.rsqrt %11 : vector<1x256xf32>
      %cst_5 = arith.constant 0.000000e+00 : f32
      %17 = vector.broadcast %cst_5 : f32 to vector<1x256xf32>
      %18 = arith.select %15, %16, %17 : vector<1x256xi1>, vector<1x256xf32>
      %19 = vector.broadcast %18 : vector<1x256xf32> to vector<4x256xf32>
      %20 = arith.mulf %8, %19 : vector<4x256xf32>
      %c0_6 = arith.constant 0 : index
      %21 = memref.load %arg3[%c0_6] : memref<1xf32, #tpu.memory_space<smem>>
      %c0_7 = arith.constant 0 : index
      %c0_8 = arith.constant 0 : index
      %22 = vector.load %arg8[%c0_7, %c0_8] : memref<4x1xf32, #tpu.memory_space<vmem>>, vector<4x1xf32>
      %cst_9 = arith.constant 2.560000e+02 : f32
      %23 = vector.broadcast %cst_9 : f32 to vector<4x1xf32>
      %24 = arith.addf %23, %22 : vector<4x1xf32>
      %25 = vector.broadcast %21 : f32 to vector<4x1xf32>
      %26 = arith.divf %25, %24 : vector<4x1xf32>
      %c0_10 = arith.constant 0 : index
      %c0_11 = arith.constant 0 : index
      %27 = vector.load %arg7[%c0_10, %c0_11] : memref<4x4xf32, #tpu.memory_space<vmem>>, vector<4x4xf32>
      %cst_12 = arith.constant dense<0.000000e+00> : vector<4x256xf32>
      %28 = tpu.matmul %27, %20, %cst_12 {dimension_numbers = #tpu.dot_dimension_numbers<[1], [0], [0], [1], [0, 0, 1, 1], [], []>} : vector<4x4xf32>, vector<4x256xf32>, vector<4x256xf32> -> vector<4x256xf32>
      %29 = vector.broadcast %13 : vector<1x256xf32> to vector<4x256xf32>
      %30 = arith.addf %29, %28 : vector<4x256xf32>
      %31 = vector.broadcast %26 : vector<4x1xf32> to vector<4x256xf32>
      %32 = arith.mulf %31, %30 : vector<4x256xf32>
      %33 = arith.addf %8, %32 : vector<4x256xf32>
      %c0_13 = arith.constant 0 : index
      %c0_14 = arith.constant 0 : index
      %c0_15 = arith.constant 0 : index
      %34 = vector.load %arg5[%c0_13, %c0_14, %c0_15] : memref<1x4x256xf32, #tpu.memory_space<vmem>>, vector<1x4x256xf32>
      %35 = vector.shape_cast %34 : vector<1x4x256xf32> to vector<4x256xf32>
      %36 = vector.shape_cast %33 : vector<4x256xf32> to vector<1x4x256xf32>
      tpu.vector_store %arg5[%c0_13, %c0_14, %c0_15], %36 {strides = array<i32>} : memref<1x4x256xf32, #tpu.memory_space<vmem>>, vector<1x4x256xf32>,
    } else {
    }
    return
  }
  func.func @transform_0(%arg0: i32, %arg1: i32, %arg2: i32) -> i32 {
    %c0_i32 = arith.constant 0 : i32
    %c0_i32_0 = arith.constant 0 : i32
    return %c0_i32 : i32
  }
  func.func @transform_1(%arg0: i32, %arg1: i32, %arg2: i32) -> (i32, i32, i32) {
    %c1_i32 = arith.constant 1 : i32
    %0 = arith.subi %c1_i32, %arg1 : i32
    %1 = arith.muli %arg2, %0 : i32
    %c0_i32 = arith.constant 0 : i32
    %2 = arith.muli %c0_i32, %arg1 : i32
    %3 = arith.addi %1, %2 : i32
    %c0_i32_0 = arith.constant 0 : i32
    %c0_i32_1 = arith.constant 0 : i32
    return %arg0, %c0_i32_0, %3 : i32, i32, i32
  }
  func.func @transform_2(%arg0: i32, %arg1: i32, %arg2: i32) -> (i32, i32, i32) {
    %0 = arith.muli %arg2, %arg1 : i32
    %c0_i32 = arith.constant 0 : i32
    %c0_i32_0 = arith.constant 0 : i32
    return %arg0, %c0_i32, %0 : i32, i32, i32
  }
}

</mosaic_0001>

<bundles_post_ra>
// kernel: tpu_custom_call.1
= control target key start
LH: loop header
LB: loop body
LE: loop exit
PB: predicated region body
PF: predicated region fallthrough
CT: control target
= control target key end

     0   :  { %s1113_s0 = inlined_call_operand.<no memory space> [shape: f32[1], index: 0, kind: input, shape index: {}]   ;;  %s1114_s1 = inlined_call_operand.hbm [shape: f32[2,4,256], index: 1, kind: input, shape index: {}]   ;;  %s1115_s2 = inlined_call_operand.hbm [shape: f32[2,4,256], index: 2, kind: output, shape index: {}]  }
   0x1   :  { %7 = sst [smem:[#allocation5]] %s1113_s0 }
   0x2   :  { %8 = vsyncpa [#allocation7], 0 }
   0x3   :  { %10 = vsyncpa [#allocation7 + $0x1], 0 }
   0x4   :  { %11 = vsyncpa [#allocation8], 0 }
   0x5   :  { %13 = vsyncpa [#allocation8 + $0x1], 0  ;;  %s900_s11 = smov 0   ;;  %s902_s12 = smov 0  }
   0x6   :  { %s904_s13 = smov 0   ;;  %s906_s14 = smov 0  }
   0x7   :  { %s908_s15 = smov 0   ;;  %s910_s16 = smov 0  }
   0x8   :  { %s912_s17 = smov 0   ;;  %s914_s18 = smov 0  }
   0x9 LB: > { %s631_s0 = sadd.s32 4294967295, %s875_s18   ;;  %s632_s19 = sadd.s32 4294967294, %s875_s18   ;;  %s875_s18 = sphi %s914_s18, %s19_s18   ;;  %s871_s17 = sphi %s912_s17, %s1132_s17   ;;  %s867_s16 = sphi %s910_s16, %s1131_s16   ;;  %s863_s15 = sphi %s908_s15, %s1130_s15   ;;  %s859_s14 = sphi %s906_s14, %s1129_s14   ;;  %s855_s13 = sphi %s904_s13, %s1128_s13   ;;  %s851_s12 = sphi %s902_s12, %s1127_s12   ;;  %s847_s11 = sphi %s900_s11, %s1126_s11  }
   0xa   : > { %s34_s20 = sadd.s32 1, %s867_s16  ;;  %s38_s21 = sadd.s32 1, %s871_s17 }
   0xb   : > { %p36_p0 = scmp.ge.s32.totalorder %s34_s20, 2  ;;  %s72_s22 = sadd.s32 1, %s855_s13 }
   0xc   : > { %p79_p1 = scmp.ne.s32.totalorder %s855_s13, %s851_s12  ;;  %p80_p2 = scmp.eq.s32.totalorder %s875_s18, 0 }
   0xd   : > { %s1134_s20 = smov (%p36_p0, %s34_s20), 0  ;;  %s1136_s21 = smov (!%p36_p0, %s38_s21), %s871_s17 }
   0xe   : > { %p951_p3 = por %p80_p2, %p79_p1  ;;  %p85_p4 = scmp.ne.s32.totalorder %s851_s12, %s847_s11 }
   0xf   : > { %p40_p5 = scmp.ge.s32.totalorder %s1136_s21, 2  ;;  %p86_p6 = scmp.eq.s32.totalorder %s631_s0, 0 }
  0x10   : > { %p113_p7 = scmp.eq.s32.totalorder %s631_s0, 3  ;;  %p119_p8 = scmp.eq.s32.totalorder %s632_s19, 3 }
  0x11   : > { %s1138_s21 = smov (%p40_p5, %s1136_s21), 0  ;;  %p959_p9 = por %p86_p6, %p85_p4 }
  0x12   : > { %p963_p10 = por %p113_p7, %p79_p1  ;;  %s67_s26 = ssub.s32 %s871_s17, %s1138_s21 }
  0x13   : > { %p969_p11 = por %p119_p8, %p85_p4  ;;  %p70_p12 = scmp.eq.s32.totalorder %s67_s26, 0 }
  0x14   : > { %s1119_s25 = scalar_select %p963_p10, 1, 0 }
  0x15   : > { %s1120_s27 = scalar_select %p969_p11, 1, 0 }
  0x16   : > { %p665_p13 = scmp.lt.s32.totalorder %s875_s18, 4  ;;  %s142_s28 = sand.u32 1, %s855_s13  }
  0x17   : > { %s976_s29 = scalar_select %p70_p12, %s855_s13, %s72_s22  }
  0x18   : > { %s635_s30 = sshll.u32 %s142_s28, 3  ;;  %s651_s3 = sshll.u32 %s871_s17, 7 }
  0x19   : > { %s982_s6 = scalar_lea.hbm %s1114_s1, %s651_s3  ;;  %s146_s7 = scalar_lea.vmem [#allocation6], %s635_s30 }
  0x1a   : > { %s158_s8 = sshll.u32 %s146_s7, 4  ;;  %p988_p0 = pnand %p665_p13, %p951_p3  ;;  %s984_s8 = int_to_ptr.vmem [resolvable:$true] %s158_s8 }
  0x1b   : > { %s143_s10 = scalar_lea.sflag [#allocation7], %s142_s28  ;;  %s747_s0 = scalar_lea.hbm %s982_s6, 128 }
  0x1c   : > { %p748_p4 = scmp.ne.s32.totalorder %s982_s6, %s747_s0  ;;  %p749_p5 = pneg %p988_p0 }
  0x1d   : > { %s752_s23 = scalar_lea.hbm %s1114_s1, 256  ;;  %p753_p3 = scmp.lt.u32.totalorder %s982_s6, %s1114_s1 }
  0x1e   : > { %p750_p6 = pnand %p749_p5, %p748_p4  ;;  %p754_p8 = scmp.lt.u32.totalorder %s752_s23, %s747_s0 }
  0x1f   : > { %p756_p13 = scmp.lt.u32.totalorder %s747_s0, %s982_s6 }
  0x20   : > { %p751_p7 = pneg %p750_p6  ;;  %p755_p12 = por %p754_p8, %p753_p3 }
  0x22   : > { %p757_p1 = por %p756_p13, %p755_p12 }
  0x24   : > { %p758_p2 = pnand %p757_p1, %p751_p7 }
  0x26   : > { %761 = shalt.err (!%p758_p2)
}
  0x27   : > { %s762_s28 = scalar_lea.vmem %s984_s8, 128  ;;  %s877_s3 = smov [#allocation6]  }
  0x28   : > { %p763_p4 = scmp.ne.s32.totalorder %s984_s8, %s762_s28  ;;  %s767_s4 = sshll.u32 %s877_s3, 4  ;;  %s768_s4 = int_to_ptr.vmem [resolvable:$false] %s767_s4 }
  0x29   : > { %s769_s5 = scalar_lea.vmem %s768_s4, 256  ;;  %p770_p10 = scmp.lt.s32.totalorder %s984_s8, %s768_s4 }
  0x2a   : > { %p765_p6 = pnand %p763_p4, %p749_p5  ;;  %p771_p3 = scmp.lt.s32.totalorder %s769_s5, %s762_s28 }
  0x2c   : > { %p766_p11 = pneg %p765_p6  ;;  %p772_p8 = por %p771_p3, %p770_p10 }
  0x2e   : > { %p773_p12 = pnand %p772_p8, %p766_p11 }
  0x30   : > { %776 = shalt.err (!%p773_p12)
}
  0x31   : > { %660 = dma.hbm_to_vmem [thread:$0]  (!%p988_p0), %s982_s6, 128, %s984_s8, %s143_s10  }
  0x32   : > { %p1122_p1 = scmp.lt.s32.totalorder %s875_s18, 5  ;;  %p1123_p2 = scmp.ge.s32.totalorder %s875_s18, 1 }
  0x34   : > { %p164_p5 = pnand %p1123_p2, %p1122_p1 }
  0x35   : > { %s1024_s7 = sand.u32 (!%p164_p5), 1, %s851_s12  }
  0x36   : > { %167 = sbr.rel (%p164_p5) target bundleno = 604 (0x25c), region = 28  ;;  %s639_s0 = sshll.u32 (!%p164_p5), %s1024_s7, 3 }
  0x37   : > { %s170_s19 = scalar_lea.sflag (!%p164_p5), [#allocation7], %s1024_s7  ;;  %s173_s22 = scalar_lea.vmem (!%p164_p5), [#allocation6], %s639_s0 }
  0x3d   : > { %838 = dma.done.wait (%p959_p9), %s170_s19, 128  }
  0x3e   : > { %840 = vsyncadd (%p959_p9), %s170_s19, 4294967168  ;;  %s1032_s9 = scalar_lea.vmem [#allocation9], %s639_s0  ;;  %p641_p10 = scmp.ne.s32.totalorder %s859_s14, 0 }
  0x3f   : > { %v211_v0 = vld [vmem:[%s173_s22] sm:$0xff] (!%p641_p10)  ;;  %vm220_vm0 = vcmask (!%p641_p10), 1043456   ;;  %vm207_vm1 = vcmask (!%p641_p10), 27648   ;;  %v878_v4 = vmov (!%p641_p10), 0.0   ;;  %vm209_vm4 = vcmask (!%p641_p10), 3072  }
  0x40   : > { %202 = sbr.rel (%p641_p10) target bundleno = 318 (0x13e), region = 36  ;;  %215 = vst [vmem:[#allocation2] sm:$0xff] (!%p641_p10), %v211_v0  ;;  %v216_v1 = vmul.f32 (!%p641_p10), %v211_v0, %v211_v0  ;;  %v236_v2 = vcombine.high (!%p641_p10), %v211_v0, %v211_v0  ;;  %v238_v3 = vsel (!%p641_p10), %vm220_vm0, %v211_v0, 0.0  ;;  %208 = vst.msk [vmem:[#allocation3] sm:$0xf] (!%p641_p10), %vm207_vm1, %v878_v4 }
  0x41   : > { %v239_v9 = vrot.slane (!%p641_p10), %v238_v3, 4  ;;  %210 = vst.msk [vmem:[#allocation4] sm:$0xf] (!%p641_p10), %vm209_vm4, %v878_v4 }
  0x42   : > { %v218_v5 = vcombine.high (!%p641_p10), %v216_v1, %v216_v1  ;;  %v221_v6 = vsel (!%p641_p10), %vm220_vm0, %v216_v1, 0.0  ;;  %v245_v7 = vsel (!%p641_p10), %vm220_vm0, %v236_v2, 0.0  ;;  %335 = vmatprep.mubr.f32.mxu0 (!%p641_p10), %v236_v2 }
  0x43   : > { %v222_v8 = vrot.slane (!%p641_p10), %v221_v6, 4  ;;  %v246_v13 = vrot.slane (!%p641_p10), %v245_v7, 4  ;;  %v240_v16 = vadd.f32 (!%p641_p10), %v239_v9, %v238_v3 }
  0x44   : > { %v228_v10 = vsel (!%p641_p10), %vm220_vm0, %v218_v5, 0.0 }
  0x45   : > { %v223_v11 = vadd.f32 (!%p641_p10), %v222_v8, %v221_v6  ;;  %v229_v12 = vrot.slane (!%p641_p10), %v228_v10, 4  ;;  %v247_v19 = vadd.f32 (!%p641_p10), %v246_v13, %v245_v7  ;;  %v241_v22 = vrot.slane (!%p641_p10), %v240_v16, 2 }
  0x47   : > { %v224_v14 = vrot.slane %v223_v11, 2  ;;  %v230_v15 = vadd.f32 %v229_v12, %v228_v10  ;;  %v248_v25 = vrot.slane %v247_v19, 2  ;;  %v242_v27 = vadd.f32 %v241_v22, %v240_v16  ;;  %v267_v53 = vld [vmem:[#allocation3] sm:$0xf] }
  0x48   : > { %v344_v50 = vld [vmem:[#allocation4] sm:$0xf] }
  0x49   : > { %v225_v17 = vadd.f32 %v224_v14, %v223_v11  ;;  %v231_v18 = vrot.slane %v230_v15, 2  ;;  %v249_v28 = vadd.f32 %v248_v25, %v247_v19  ;;  %v243_v29 = vrot.slane %v242_v27, 1 }
  0x4b   : > { %v226_v20 = vrot.slane %v225_v17, 1  ;;  %v232_v21 = vadd.f32 %v231_v18, %v230_v15  ;;  %v250_v30 = vrot.slane %v249_v28, 1  ;;  %v244_v31 = vadd.f32 %v243_v29, %v242_v27 }
  0x4d   : > { %v227_v23 = vadd.f32 %v226_v20, %v225_v17  ;;  %v233_v24 = vrot.slane %v232_v21, 1  ;;  %v251_v33 = vadd.f32 %v250_v30, %v249_v28 }
  0x4f   : > { %v234_v26 = vadd.f32 %v233_v24, %v232_v21  ;;  %735 = vrsqrt.f32 %v227_v23  ;;  %vm252_vm2 = vcmp.gt.f32.partialorder %v227_v23, 0.0 }
  0x51   : > { %737 = vrsqrt.f32 %v234_v26  ;;  %vm253_vm3 = vcmp.gt.f32.partialorder %v234_v26, 0.0 }
  0x59   : > { %v736_v32 = vpop.eup %735 }
  0x5a   : > { %v256_v34 = vsel %vm252_vm2, %v736_v32, 0.0 }
  0x5b   : > { %v738_v35 = vpop.eup %737  ;;  %v263_v36 = vmul.f32 %v256_v34, %v244_v31 }
  0x5c   : > { %v257_v37 = vsel %vm253_vm3, %v738_v35, 0.0 }
  0x5d   : > { %v260_v38 = vcombine.low %v256_v34, %v257_v37  ;;  %v264_v39 = vmul.f32 %v257_v37, %v251_v33  ;;  %v265_v40 = vadd.f32 1e-06, %v263_v36 }
  0x5f   : > { %v262_v41 = vmul.f32 %v260_v38, %v211_v0  ;;  %v266_v42 = vadd.f32 1e-06, %v264_v39 }
  0x61   : > { %v269_v43 = vcombine.high %v262_v41, %v262_v41  ;;  %v347_v44 = vcombine.low %v265_v40, %v266_v42 }
  0x63   : > { %271 = vmatprep.subr.mxu0 %v269_v43  ;;  %v349_v45 = vmul.f32 %v347_v44, %v262_v41 }
  0x64   : > { %272 = vmatpush1.xpose.msra.mxu0 %v262_v41 }
  0x65   : > { %v351_v46 = vcombine.high %v349_v45, %v349_v45  ;;  %v353_v47 = vsel %vm220_vm0, %v349_v45, 0.0 }
  0x67   : > { %336 = vmatmul.mubr.f32.vlgmr.msra.gmra.mrb[0].mxu0 %v211_v0  ;;  %v354_v48 = vsel %vm220_vm0, %v351_v46, 0.0 }
  0x68   : > { %v355_v49 = vadd.f32 %v354_v48, %v353_v47 }
  0x6a   : > { %356 = vadd.xlane.f32.xlu0 %v355_v49 }
  0xf7   : > { %v357_v51 = vpop.xlane.xlu0 %356 }
  0xf8   : > { %v358_v52 = vadd.f32 %v357_v51, %v344_v50 }
  0xfa   : > { %360 = vst.msk [vmem:[#allocation4] sm:$0xf] %vm209_vm4, %v358_v52 }
 0x13a   : > { %v337_v54 = vpop.f32.mrb[0].mxu0 }
 0x13b   : > { %v341_v55 = vadd.f32 %v337_v54, %v267_v53  ;;  %v339_v56 = vpop.f32.mrb[1].mxu0 }
 0x13d   : > { %343 = vst.msk [vmem:[#allocation3] sm:$0xf] %vm207_vm1, %v341_v55 }
 0x13e PF: > { %p642_p9 = scmp.ne.s32.totalorder %s859_s14, 1 }
 0x13f   : > { %v1044_v57 = vld [vmem:[#allocation2] sm:$0xff] (!%p642_p9)  ;;  %vm373_vm5 = vcmask (!%p642_p9), 1043456   ;;  %v879_v59 = vmov (!%p642_p9), 0.0   ;;  %v417_v60 = vld [vmem:[#allocation4] sm:$0xf] (!%p642_p9)  ;;  %v880_v61 = vmov (!%p642_p9), 0  }
 0x140   : > { %364 = sbr.rel (%p642_p9) target bundleno = 579 (0x243), region = 44  ;;  %v369_v58 = vmul.f32 (!%p642_p9), %v1044_v57, %v1044_v57  ;;  %497 = vmatprep.mubr.f32.mxu0 (!%p642_p9), %v879_v59  ;;  %739 = vset.pattern.permute.xlu0 (!%p642_p9), %v880_v61  ;;  %v418_v62 = vadd.f32 (!%p642_p9), 256.0, %v417_v60  ;;  %s416_s24 = sld [smem:[#allocation5]] (!%p642_p9)  ;;  %vm425_vm8 = vcmask (!%p642_p9), 31744   ;;  %v389_v25 = vcombine.high (!%p642_p9), %v1044_v57, %v1044_v57 }
 0x141   : > { %v391_v26 = vsel (!%p642_p9), %vm373_vm5, %v1044_v57, 0.0 }
 0x142   : > { %v371_v63 = vcombine.high (!%p642_p9), %v369_v58, %v369_v58  ;;  %v374_v0 = vsel (!%p642_p9), %vm373_vm5, %v369_v58, 0.0  ;;  %741 = vrcp.f32 (!%p642_p9), %v418_v62  ;;  %v398_v27 = vsel (!%p642_p9), %vm373_vm5, %v389_v25, 0.0 }
 0x143   : > { %v375_v1 = vrot.slane (!%p642_p9), %v374_v0, 4  ;;  %v392_v28 = vrot.slane (!%p642_p9), %v391_v26, 4  ;;  %v399_v29 = vrot.slane (!%p642_p9), %v398_v27, 4 }
 0x144   : > { %v381_v2 = vsel (!%p642_p9), %vm373_vm5, %v371_v63, 0.0  ;;  %v422_v24 = vld [vmem:[#allocation3] sm:$0xf] (!%p642_p9) }
 0x145   : > { %v376_v3 = vadd.f32 (!%p642_p9), %v375_v1, %v374_v0  ;;  %v382_v4 = vrot.slane (!%p642_p9), %v381_v2, 4  ;;  %v393_v30 = vadd.f32 (!%p642_p9), %v392_v28, %v391_v26  ;;  %v400_v31 = vadd.f32 (!%p642_p9), %v399_v29, %v398_v27 }
 0x146   : > { %v419_v11 = vstv (!%p642_p9), %s416_s24 }
 0x147   : > { %v377_v5 = vrot.slane %v376_v3, 2  ;;  %v383_v6 = vadd.f32 %v382_v4, %v381_v2  ;;  %v394_v32 = vrot.slane %v393_v30, 2  ;;  %v401_v33 = vrot.slane %v400_v31, 2 }
 0x149   : > { %v378_v7 = vadd.f32 %v377_v5, %v376_v3  ;;  %v384_v8 = vrot.slane %v383_v6, 2  ;;  %v395_v34 = vadd.f32 %v394_v32, %v393_v30  ;;  %v402_v35 = vadd.f32 %v401_v33, %v400_v31 }
 0x14b   : > { %v379_v9 = vrot.slane %v378_v7, 1  ;;  %v385_v10 = vadd.f32 %v384_v8, %v383_v6  ;;  %v396_v36 = vrot.slane %v395_v34, 1  ;;  %v403_v37 = vrot.slane %v402_v35, 1 }
 0x14c   : > { %v742_v12 = vpop.eup %741 }
 0x14d   : > { %v380_v13 = vadd.f32 %v379_v9, %v378_v7  ;;  %v386_v14 = vrot.slane %v385_v10, 1  ;;  %v421_v15 = vmul.f32 %v742_v12, %v419_v11  ;;  %v397_v38 = vadd.f32 %v396_v36, %v395_v34 }
 0x14e   : > { %v404_v39 = vadd.f32 %v403_v37, %v402_v35 }
 0x14f   : > { %v387_v16 = vadd.f32 %v386_v14, %v385_v10  ;;  %743 = vrsqrt.f32 %v380_v13  ;;  %508 = vperm.xlu0 %739, %v421_v15   ;;  %vm405_vm6 = vcmp.gt.f32.partialorder %v380_v13, 0.0 }
 0x151   : > { %745 = vrsqrt.f32 %v387_v16  ;;  %vm406_vm7 = vcmp.gt.f32.partialorder %v387_v16, 0.0 }
 0x159   : > { %v744_v17 = vpop.eup %743 }
 0x15a   : > { %v409_v18 = vsel %vm405_vm6, %v744_v17, 0.0 }
 0x15b   : > { %v746_v19 = vpop.eup %745 }
 0x15c   : > { %v410_v20 = vsel %vm406_vm7, %v746_v19, 0.0 }
 0x15d   : > { %v413_v21 = vcombine.low %v409_v18, %v410_v20 }
 0x15f   : > { %v415_v22 = vmul.f32 %v413_v21, %v1044_v57 }
 0x161   : > { %v424_v23 = vcombine.high %v415_v22, %v415_v22 }
 0x163   : > { %643 = vmatprep.subr.msk.mxu0 %vm373_vm5, %v424_v23 }
 0x164   : > { %644 = vmatpush1.msk.msra.mxu0 %vm373_vm5, %v415_v22 }
 0x165   : > { %645 = vmatmul.mubr.msk.f32.vlgmr.msra.gmra.mrb[0].mxu0 %vm425_vm8, %v422_v24 }
 0x1ce   : > { %v509_v41 = vpop.permute.xlu0 %508 }
 0x238   : > { %v499_v40 = vpop.f32.mrb[0].mxu0 }
 0x239   : > { %v504_v42 = vadd.f32 %v499_v40, %v397_v38  ;;  %v501_v43 = vpop.f32.mrb[1].mxu0 }
 0x23a   : > { %v505_v44 = vadd.f32 %v501_v43, %v404_v39 }
 0x23b   : > { %v511_v45 = vmul.f32 %v509_v41, %v504_v42 }
 0x23c   : > { %v512_v46 = vmul.f32 %v509_v41, %v505_v44 }
 0x23e   : > { %v515_v47 = vcombine.low %v511_v45, %v512_v46 }
 0x240   : > { %v517_v48 = vadd.f32 %v515_v47, %v1044_v57 }
 0x242   : > { %518 = vst [vmem:[%s1032_s9] sm:$0xff] %v517_v48 }
 0x243 PF: > { %s652_s14 = sshll.u32 %s863_s15, 7  ;;  %s537_s23 = sshll.u32 %s1032_s9, 4  ;;  %s538_s23 = int_to_ptr.vmem [resolvable:$true] %s537_s23 }
 0x244   : > { %s1064_s10 = scalar_lea.hbm %s1115_s2, %s652_s14  ;;  %s520_s26 = scalar_lea.sflag [#allocation8], %s1024_s7 }
 0x245   : > { %s777_s30 = scalar_lea.vmem %s538_s23, 128  ;;  %p1124_p0 = scmp.ne.s32.totalorder %s1119_s25, 0 }
 0x246   : > { %p778_p11 = scmp.ne.s32.totalorder %s538_s23, %s777_s30  ;;  %s881_s28 = smov [#allocation9]  }
 0x247   : > { %s781_s3 = sshll.u32 %s881_s28, 4  ;;  %s782_s3 = int_to_ptr.vmem [resolvable:$false] %s781_s3 }
 0x248   : > { %p779_p7 = pnand %p778_p11, %p1124_p0  ;;  %s783_s4 = scalar_lea.vmem %s782_s3, 256 }
 0x249   : > { %p784_p4 = scmp.lt.s32.totalorder %s538_s23, %s782_s3  ;;  %p785_p6 = scmp.lt.s32.totalorder %s783_s4, %s777_s30 }
 0x24a   : > { %p780_p13 = pneg %p779_p7 }
 0x24b   : > { %p786_p3 = por %p785_p6, %p784_p4 }
 0x24d   : > { %p787_p8 = pnand %p786_p3, %p780_p13 }
 0x24f   : > { %790 = shalt.err (!%p787_p8)
}
 0x250   : > { %s791_s15 = scalar_lea.hbm %s1064_s10, 128  ;;  %s795_s0 = scalar_lea.hbm %s1115_s2, 256 }
 0x251   : > { %p792_p12 = scmp.ne.s32.totalorder %s1064_s10, %s791_s15  ;;  %p796_p5 = scmp.lt.u32.totalorder %s1064_s10, %s1115_s2 }
 0x252   : > { %p797_p10 = scmp.lt.u32.totalorder %s795_s0, %s791_s15  ;;  %p799_p11 = scmp.lt.u32.totalorder %s791_s15, %s1064_s10 }
 0x253   : > { %p793_p1 = pnand %p792_p12, %p1124_p0 }
 0x254   : > { %p798_p9 = por %p797_p10, %p796_p5 }
 0x255   : > { %p794_p2 = pneg %p793_p1 }
 0x256   : > { %p800_p7 = por %p799_p11, %p798_p9 }
 0x258   : > { %p801_p13 = pnand %p800_p7, %p794_p2 }
 0x25a   : > { %804 = shalt.err (!%p801_p13)
}
 0x25b   : > { %655 = dma.vmem_to_hbm [thread:$0]  (%p1124_p0), %s538_s23, 128, %s1064_s10, %s520_s26  }
 0x25c PF: > { %p666_p4 = scmp.ge.s32.totalorder %s875_s18, 2  ;;  %s549_s9 = sand.u32 1, %s847_s11  }
 0x25d   : > { %p1125_p6 = scmp.ne.s32.totalorder %s1120_s27, 0  ;;  %s550_s24 = scalar_lea.sflag [#allocation8], %s549_s9 }
 0x25f   : > { %p662_p3 = pnand %p666_p4, %p1125_p6 }
 0x261   : > { %842 = dma.done.wait (!%p662_p3), %s550_s24, 128  }
 0x262   : > { %844 = vsyncadd (!%p662_p3), %s550_s24, 4294967168  ;;  %s19_s18 = sadd.s32 1, %s875_s18   ;;  %s1126_s11 = smov %s851_s12 }
 0x263   : > { %p16_p8 = scmp.ge.s32.totalorder %s19_s18, 6   ;;  %s1127_s12 = smov %s855_s13 }
 0x264   : > { %s1128_s13 = smov %s976_s29  ;;  %s1129_s14 = smov %s867_s16 }
 0x265   : > { %s1130_s15 = smov %s871_s17  ;;  %s1131_s16 = smov %s1134_s20 }
 0x266   : > { %s1132_s17 = smov %s1138_s21  ;;  %18 = sbr.rel (!%p16_p8) target bundleno = 9 (0x9), region = 87 }
 0x26d   :  { %555 = vsyncpa [#allocation7], 1 }
 0x26e   :  { %557 = vsyncpa [#allocation7 + $0x1], 1 }
 0x26f   :  { %558 = vsyncpa [#allocation8], 1 }
 0x270   :  { %560 = vsyncpa [#allocation8 + $0x1], 1 }

</bundles_post_ra>
